<compile_context>
chip_gen: v5e
topology: v5e:2x2
jax: 0.10.0
libtpu: 0.0.40
codegen_flags: <defaults>
</compile_context>

<pallas_src>
import functools

import jax
import jax.numpy as jnp
from jax import lax
from jax.experimental import pallas as pl
from jax.experimental.pallas import tpu as pltpu

IN_FEATURES = 4
HIDDEN = 32
OUT_FEATURES = 1

# Column layout of the packed weight slab (HIDDEN rows x 40 cols):
#   [0:32)  W2a     (32, 32)   linear2A weight (out, in)  -- lane-0 aligned
#   [32:36) W1      (32, 4)    linear1 weight  (out, in)
#   36      b1      (32,)
#   37      b2a     (32,)
#   38      w_lstm  (32,)      linear_lstm weight column
#   39      b_lstm  (32,)      linear_lstm bias
_SLAB_COLS = 40
_COL_W1 = HIDDEN
_COL_B1 = 36
_COL_B2A = 37
_COL_WL = 38
_COL_BL = 39

# Small MXU LHS, (8, 32):  row 0 = w2b (linear2B weight row),
#                          row 1 = w3  (linear3 weight row), rows 2..7 = 0.
_W23_ROWS = 8

# Scalar (SMEM) layout, 8 x f32:
#   0: b2b      1: b3
#   2: w_ih[i]  3: w_ih[g]  4: w_ih[o]
#   5: (b_ih+b_hh)[i]  6: (b_ih+b_hh)[g]  7: (b_ih+b_hh)[o]
_N_SCALARS = 8


def _sigmoid_eup(x):
    # Exact identity; tanh runs on the EUP slot instead of a VALU divide.
    return 0.5 * jnp.tanh(0.5 * x) + 0.5


def _round_up(n, m):
    return ((n + m - 1) // m) * m


def model_kernel(s_ref, w_ref, w23_ref, x_ref, o_ref):
    w = w_ref[...]                                   # (32, 40) resident slab
    w2a = w[:, 0:HIDDEN]                             # (32, 32)
    w1 = w[:, _COL_W1:_COL_W1 + IN_FEATURES]         # (32, 4)
    b1 = w[:, _COL_B1:_COL_B1 + 1]                   # (32, 1)
    b2a = w[:, _COL_B2A:_COL_B2A + 1]
    wl = w[:, _COL_WL:_COL_WL + 1]
    bl = w[:, _COL_BL:_COL_BL + 1]
    w23 = w23_ref[...]                               # (8, 32) resident

    x_blk = x_ref[...]                               # (TB, 4): batch on sublanes

    # linear1 + relu: MXU absorbs the transposed activations (A @ B^T pattern).
    h = lax.dot_general(w1, x_blk, (((1,), (1,)), ((), ())),
                        preferred_element_type=jnp.float32) + b1
    h = jnp.maximum(h, 0.0)                          # (32, TB)

    # linear2A + relu (MXU); residual branch.
    h = jnp.dot(w2a, h, preferred_element_type=jnp.float32) + b2a
    h = jnp.maximum(h, 0.0)                          # (32, TB) == residual

    # Fused N=1 projections of the residual on the (idle) MXU:
    #   row 0 -> w2b . residual   (linear2B pre-activation)
    #   row 1 -> w3  . residual   (reused for linear3, avoids hl+residual add)
    zr = jnp.dot(w23, h, preferred_element_type=jnp.float32)       # (8, TB)
    z = jnp.maximum(zr[0:1, :] + s_ref[0], 0.0)      # linear2B + relu, (1, TB)
    w3_res = zr[1:2, :]                              # (1, TB)

    # LSTMCell(1, 1) with zero initial state: gates are scalar FMAs from SMEM.
    # f gate and W_hh contribute nothing since h0 = c0 = 0.
    i_g = _sigmoid_eup(z * s_ref[2] + s_ref[5])
    g_g = jnp.tanh(z * s_ref[3] + s_ref[6])
    o_g = _sigmoid_eup(z * s_ref[4] + s_ref[7])
    h_lstm = o_g * jnp.tanh(i_g * g_g)               # (1, TB)

    # linear_lstm + relu: K=1 -> outer-product broadcast FMA on the VPU.
    hl = jnp.maximum(wl * h_lstm + bl, 0.0)          # (32, TB)

    # linear3(hl + residual) = w3.hl + w3.residual + b3 ; w3.hl via the MXU.
    zo = jnp.dot(w23, hl, preferred_element_type=jnp.float32)      # (8, TB)
    o_ref[...] = _sigmoid_eup(zo[1:2, :] + w3_res + s_ref[1])      # (1, TB)


def pack_params(p):
    """Pack PyTorch-layout parameters into one VMEM slab + one tiny MXU LHS + SMEM scalars."""
    wslab = jnp.zeros((HIDDEN, _SLAB_COLS), jnp.float32)
    wslab = wslab.at[:, 0:HIDDEN].set(p["w2a"])                       # (32, 32)
    wslab = wslab.at[:, _COL_W1:_COL_W1 + IN_FEATURES].set(p["w1"])   # (32, 4)
    wslab = wslab.at[:, _COL_B1].set(p["b1"])
    wslab = wslab.at[:, _COL_B2A].set(p["b2a"])
    wslab = wslab.at[:, _COL_WL].set(p["w_lstm"][:, 0])
    wslab = wslab.at[:, _COL_BL].set(p["b_lstm_lin"])

    w23 = jnp.zeros((_W23_ROWS, HIDDEN), jnp.float32)
    w23 = w23.at[0, :].set(p["w2b"][0, :])
    w23 = w23.at[1, :].set(p["w3"][0, :])

    bg = p["b_ih"] + p["b_hh"]                       # (4,) gate order: i, f, g, o
    scalars = jnp.stack([
        p["b2b"][0], p["b3"][0],
        p["w_ih"][0, 0], p["w_ih"][2, 0], p["w_ih"][3, 0],
        bg[0], bg[2], bg[3],
    ]).astype(jnp.float32)                           # (8,)
    return scalars, wslab, w23


def _choose_tile(batch, max_tile):
    """Balanced lane tile: multiple of 128, >=2 grid steps for B>=256 (v7x megacore)."""
    max_tile = max(128, (int(max_tile) // 128) * 128)
    num_tiles = -(-batch // max_tile)
    if batch >= 256:
        num_tiles = max(num_tiles, 2)
    tb = _round_up(-(-batch // num_tiles), 128)
    grid_b = -(-batch // tb)
    return tb, grid_b


@functools.partial(jax.jit, static_argnames=("max_tile",))
def model_forward(x, params, *, max_tile=2048):
    """x: (B, 4) f32 -> (B, 1) f32, matching Model.forward."""
    scalars, wslab, w23 = pack_params(params)
    x = x.astype(jnp.float32)
    B = x.shape[0]

    TB, grid_b = _choose_tile(B, max_tile)

    out = pl.pallas_call(
        model_kernel,
        out_shape=jax.ShapeDtypeStruct((1, B), jnp.float32),
        grid=(grid_b,),
        in_specs=[
            pl.BlockSpec(memory_space=pltpu.MemorySpace.SMEM),           # scalars
            pl.BlockSpec((HIDDEN, _SLAB_COLS), lambda i: (0, 0)),        # weight slab (resident)
            pl.BlockSpec((_W23_ROWS, HIDDEN), lambda i: (0, 0)),         # [w2b; w3] (resident)
            pl.BlockSpec((TB, IN_FEATURES), lambda i: (i, 0)),           # x batch tile (no pre-pass)
        ],
        out_specs=pl.BlockSpec((1, TB), lambda i: (0, i)),               # lane-dense output slab
        compiler_params=pltpu.CompilerParams(
            dimension_semantics=("parallel",)),
    )(scalars, wslab, w23, x)

    return out.reshape(B, OUT_FEATURES)              # free: (1,B) row-major == (B,1)


def init_params(key):
    """Deterministic init with PyTorch layouts: Linear W is (out, in), b is (out,)."""
    ks = jax.random.split(key, 14)

    def lin(kw, kb, fan_out, fan_in):
        bound = 1.0 / float(fan_in) ** 0.5
        w = jax.random.uniform(kw, (fan_out, fan_in), jnp.float32, -bound, bound)
        b = jax.random.uniform(kb, (fan_out,), jnp.float32, -bound, bound)
        return w, b

    w1, b1 = lin(ks[0], ks[1], HIDDEN, IN_FEATURES)
    w2a, b2a = lin(ks[2], ks[3], HIDDEN, HIDDEN)
    w2b, b2b = lin(ks[4], ks[5], OUT_FEATURES, HIDDEN)
    wl, bl = lin(ks[6], ks[7], HIDDEN, 1)             # linear_lstm: 1 -> 32
    w3, b3 = lin(ks[8], ks[9], OUT_FEATURES, HIDDEN)

    # LSTMCell(input_size=1, hidden_size=1): W_ih (4,1), W_hh (4,1), b_ih/b_hh (4,)
    lstm_bound = 1.0                                  # 1/sqrt(hidden_size)
    w_ih = jax.random.uniform(ks[10], (4, 1), jnp.float32, -lstm_bound, lstm_bound)
    w_hh = jax.random.uniform(ks[11], (4, 1), jnp.float32, -lstm_bound, lstm_bound)
    b_ih = jax.random.uniform(ks[12], (4,), jnp.float32, -lstm_bound, lstm_bound)
    b_hh = jax.random.uniform(ks[13], (4,), jnp.float32, -lstm_bound, lstm_bound)

    return {
        "w1": w1, "b1": b1,
        "w2a": w2a, "b2a": b2a,
        "w2b": w2b, "b2b": b2b,
        "w_ih": w_ih, "w_hh": w_hh, "b_ih": b_ih, "b_hh": b_hh,
        "w_lstm": wl, "b_lstm_lin": bl,
        "w3": w3, "b3": b3,
    }


def reference_forward(x, p):
    """Pure-JAX reference in the original (batch, feature) layout."""
    relu = lambda v: jnp.maximum(v, 0.0)
    sig = jax.nn.sigmoid
    h = relu(x @ p["w1"].T + p["b1"])
    h = relu(h @ p["w2a"].T + p["b2a"])
    res = h
    z = relu(h @ p["w2b"].T + p["b2b"])               # (B, 1)
    # LSTMCell with h0 = c0 = 0 (PyTorch gate order i, f, g, o); f*c0 = 0.
    gates = z @ p["w_ih"].T + (p["b_ih"] + p["b_hh"])  # (B, 4)
    i_g = sig(gates[:, 0:1])
    g_g = jnp.tanh(gates[:, 2:3])
    o_g = sig(gates[:, 3:4])
    h_lstm = o_g * jnp.tanh(i_g * g_g)
    hl = relu(h_lstm @ p["w_lstm"].T + p["b_lstm_lin"])
    return sig((hl + res) @ p["w3"].T + p["b3"])


if __name__ == "__main__":
    key = jax.random.PRNGKey(0)
    k_x, k_p = jax.random.split(key)

    B = 8
    x = jax.random.normal(k_x, (B, IN_FEATURES), jnp.float32)
    params = init_params(k_p)

    out = model_forward(x, params)
    out = jax.block_until_ready(out)

    ref = reference_forward(x, params)
    assert out.shape == (B, OUT_FEATURES)
    assert jnp.allclose(out, ref, atol=1e-5, rtol=1e-5), (
        f"max abs err = {jnp.max(jnp.abs(out - ref))}")

    print("KERNEL_OK")
</pallas_src>

<mosaic_0001>
module attributes {stable_mosaic.version = 11 : i64} {
  func.func @model_kernel(%arg0: i32, %arg1: memref<8xf32, #tpu.memory_space<smem>>, %arg2: memref<32x40xf32, #tpu.memory_space<vmem>>, %arg3: memref<8x32xf32, #tpu.memory_space<vmem>>, %arg4: memref<128x4xf32, #tpu.memory_space<vmem>>, %arg5: memref<1x128xf32, #tpu.memory_space<vmem>>) attributes {dimension_semantics = [#tpu.dimension_semantics<parallel>], iteration_bounds = array<i64: 1>, scalar_prefetch = 0 : i64, scratch_operands = 0 : i64, tpu.core_type = #tpu.core_type<tc>, window_params = [{transform_indices = @transform_0, window_bounds = array<i64: 8>}, {pipeline_mode = #tpu.pipeline_mode<synchronous>, transform_indices = @transform_1, window_bounds = array<i64: 32, 40>}, {pipeline_mode = #tpu.pipeline_mode<synchronous>, transform_indices = @transform_2, window_bounds = array<i64: 8, 32>}, {transform_indices = @transform_3, window_bounds = array<i64: 128, 4>}, {transform_indices = @transform_4, window_bounds = array<i64: 1, 128>}]} {
    %c0 = arith.constant 0 : index
    %c0_0 = arith.constant 0 : index
    %0 = vector.load %arg2[%c0, %c0_0] : memref<32x40xf32, #tpu.memory_space<vmem>>, vector<32x40xf32>
    %1 = vector.extract_strided_slice %0 {offsets = [0, 0], sizes = [32, 32], strides = [1, 1]} : vector<32x40xf32> to vector<32x32xf32>
    %2 = vector.extract_strided_slice %0 {offsets = [0, 32], sizes = [32, 4], strides = [1, 1]} : vector<32x40xf32> to vector<32x4xf32>
    %3 = vector.extract_strided_slice %0 {offsets = [0, 36], sizes = [32, 1], strides = [1, 1]} : vector<32x40xf32> to vector<32x1xf32>
    %4 = vector.extract_strided_slice %0 {offsets = [0, 37], sizes = [32, 1], strides = [1, 1]} : vector<32x40xf32> to vector<32x1xf32>
    %5 = vector.extract_strided_slice %0 {offsets = [0, 38], sizes = [32, 1], strides = [1, 1]} : vector<32x40xf32> to vector<32x1xf32>
    %6 = vector.extract_strided_slice %0 {offsets = [0, 39], sizes = [32, 1], strides = [1, 1]} : vector<32x40xf32> to vector<32x1xf32>
    %c0_1 = arith.constant 0 : index
    %c0_2 = arith.constant 0 : index
    %7 = vector.load %arg3[%c0_1, %c0_2] : memref<8x32xf32, #tpu.memory_space<vmem>>, vector<8x32xf32>
    %c0_3 = arith.constant 0 : index
    %c0_4 = arith.constant 0 : index
    %8 = vector.load %arg4[%c0_3, %c0_4] : memref<128x4xf32, #tpu.memory_space<vmem>>, vector<128x4xf32>
    %cst = arith.constant dense<0.000000e+00> : vector<32x128xf32>
    %9 = tpu.matmul %2, %8, %cst {dimension_numbers = #tpu.dot_dimension_numbers<[1], [1], [0], [0], [0, 0, 1, 0], [], []>} : vector<32x4xf32>, vector<128x4xf32>, vector<32x128xf32> -> vector<32x128xf32>
    %10 = vector.broadcast %3 : vector<32x1xf32> to vector<32x128xf32>
    %11 = arith.addf %9, %10 : vector<32x128xf32>
    %cst_5 = arith.constant 0.000000e+00 : f32
    %12 = vector.broadcast %cst_5 : f32 to vector<32x128xf32>
    %13 = arith.maximumf %11, %12 : vector<32x128xf32>
    %cst_6 = arith.constant dense<0.000000e+00> : vector<32x128xf32>
    %14 = tpu.matmul %1, %13, %cst_6 {dimension_numbers = #tpu.dot_dimension_numbers<[1], [0], [0], [1], [0, 0, 1, 1], [], []>} : vector<32x32xf32>, vector<32x128xf32>, vector<32x128xf32> -> vector<32x128xf32>
    %15 = vector.broadcast %4 : vector<32x1xf32> to vector<32x128xf32>
    %16 = arith.addf %14, %15 : vector<32x128xf32>
    %cst_7 = arith.constant 0.000000e+00 : f32
    %17 = vector.broadcast %cst_7 : f32 to vector<32x128xf32>
    %18 = arith.maximumf %16, %17 : vector<32x128xf32>
    %cst_8 = arith.constant dense<0.000000e+00> : vector<8x128xf32>
    %19 = tpu.matmul %7, %18, %cst_8 {dimension_numbers = #tpu.dot_dimension_numbers<[1], [0], [0], [1], [0, 0, 1, 1], [], []>} : vector<8x32xf32>, vector<32x128xf32>, vector<8x128xf32> -> vector<8x128xf32>
    %20 = vector.extract_strided_slice %19 {offsets = [0, 0], sizes = [1, 128], strides = [1, 1]} : vector<8x128xf32> to vector<1x128xf32>
    %c0_9 = arith.constant 0 : index
    %21 = memref.load %arg1[%c0_9] : memref<8xf32, #tpu.memory_space<smem>>
    %22 = vector.broadcast %21 : f32 to vector<1x128xf32>
    %23 = arith.addf %20, %22 : vector<1x128xf32>
    %cst_10 = arith.constant 0.000000e+00 : f32
    %24 = vector.broadcast %cst_10 : f32 to vector<1x128xf32>
    %25 = arith.maximumf %23, %24 : vector<1x128xf32>
    %26 = vector.extract_strided_slice %19 {offsets = [1, 0], sizes = [1, 128], strides = [1, 1]} : vector<8x128xf32> to vector<1x128xf32>
    %c2 = arith.constant 2 : index
    %27 = memref.load %arg1[%c2] : memref<8xf32, #tpu.memory_space<smem>>
    %28 = vector.broadcast %27 : f32 to vector<1x128xf32>
    %29 = arith.mulf %25, %28 : vector<1x128xf32>
    %c5 = arith.constant 5 : index
    %30 = memref.load %arg1[%c5] : memref<8xf32, #tpu.memory_space<smem>>
    %31 = vector.broadcast %30 : f32 to vector<1x128xf32>
    %32 = arith.addf %29, %31 : vector<1x128xf32>
    %cst_11 = arith.constant 5.000000e-01 : f32
    %33 = vector.broadcast %cst_11 : f32 to vector<1x128xf32>
    %34 = arith.mulf %33, %32 : vector<1x128xf32>
    %35 = math.tanh %34 : vector<1x128xf32>
    %cst_12 = arith.constant 5.000000e-01 : f32
    %36 = vector.broadcast %cst_12 : f32 to vector<1x128xf32>
    %37 = arith.mulf %36, %35 : vector<1x128xf32>
    %cst_13 = arith.constant 5.000000e-01 : f32
    %38 = vector.broadcast %cst_13 : f32 to vector<1x128xf32>
    %39 = arith.addf %37, %38 : vector<1x128xf32>
    %c3 = arith.constant 3 : index
    %40 = memref.load %arg1[%c3] : memref<8xf32, #tpu.memory_space<smem>>
    %41 = vector.broadcast %40 : f32 to vector<1x128xf32>
    %42 = arith.mulf %25, %41 : vector<1x128xf32>
    %c6 = arith.constant 6 : index
    %43 = memref.load %arg1[%c6] : memref<8xf32, #tpu.memory_space<smem>>
    %44 = vector.broadcast %43 : f32 to vector<1x128xf32>
    %45 = arith.addf %42, %44 : vector<1x128xf32>
    %46 = math.tanh %45 : vector<1x128xf32>
    %c4 = arith.constant 4 : index
    %47 = memref.load %arg1[%c4] : memref<8xf32, #tpu.memory_space<smem>>
    %48 = vector.broadcast %47 : f32 to vector<1x128xf32>
    %49 = arith.mulf %25, %48 : vector<1x128xf32>
    %c7 = arith.constant 7 : index
    %50 = memref.load %arg1[%c7] : memref<8xf32, #tpu.memory_space<smem>>
    %51 = vector.broadcast %50 : f32 to vector<1x128xf32>
    %52 = arith.addf %49, %51 : vector<1x128xf32>
    %cst_14 = arith.constant 5.000000e-01 : f32
    %53 = vector.broadcast %cst_14 : f32 to vector<1x128xf32>
    %54 = arith.mulf %53, %52 : vector<1x128xf32>
    %55 = math.tanh %54 : vector<1x128xf32>
    %cst_15 = arith.constant 5.000000e-01 : f32
    %56 = vector.broadcast %cst_15 : f32 to vector<1x128xf32>
    %57 = arith.mulf %56, %55 : vector<1x128xf32>
    %cst_16 = arith.constant 5.000000e-01 : f32
    %58 = vector.broadcast %cst_16 : f32 to vector<1x128xf32>
    %59 = arith.addf %57, %58 : vector<1x128xf32>
    %60 = arith.mulf %39, %46 : vector<1x128xf32>
    %61 = math.tanh %60 : vector<1x128xf32>
    %62 = arith.mulf %59, %61 : vector<1x128xf32>
    %63 = vector.broadcast %5 : vector<32x1xf32> to vector<32x128xf32>
    %64 = vector.broadcast %62 : vector<1x128xf32> to vector<32x128xf32>
    %65 = arith.mulf %63, %64 : vector<32x128xf32>
    %66 = vector.broadcast %6 : vector<32x1xf32> to vector<32x128xf32>
    %67 = arith.addf %65, %66 : vector<32x128xf32>
    %cst_17 = arith.constant 0.000000e+00 : f32
    %68 = vector.broadcast %cst_17 : f32 to vector<32x128xf32>
    %69 = arith.maximumf %67, %68 : vector<32x128xf32>
    %cst_18 = arith.constant dense<0.000000e+00> : vector<8x128xf32>
    %70 = tpu.matmul %7, %69, %cst_18 {dimension_numbers = #tpu.dot_dimension_numbers<[1], [0], [0], [1], [0, 0, 1, 1], [], []>} : vector<8x32xf32>, vector<32x128xf32>, vector<8x128xf32> -> vector<8x128xf32>
    %71 = vector.extract_strided_slice %70 {offsets = [1, 0], sizes = [1, 128], strides = [1, 1]} : vector<8x128xf32> to vector<1x128xf32>
    %72 = arith.addf %71, %26 : vector<1x128xf32>
    %c1 = arith.constant 1 : index
    %73 = memref.load %arg1[%c1] : memref<8xf32, #tpu.memory_space<smem>>
    %74 = vector.broadcast %73 : f32 to vector<1x128xf32>
    %75 = arith.addf %72, %74 : vector<1x128xf32>
    %cst_19 = arith.constant 5.000000e-01 : f32
    %76 = vector.broadcast %cst_19 : f32 to vector<1x128xf32>
    %77 = arith.mulf %76, %75 : vector<1x128xf32>
    %78 = math.tanh %77 : vector<1x128xf32>
    %cst_20 = arith.constant 5.000000e-01 : f32
    %79 = vector.broadcast %cst_20 : f32 to vector<1x128xf32>
    %80 = arith.mulf %79, %78 : vector<1x128xf32>
    %cst_21 = arith.constant 5.000000e-01 : f32
    %81 = vector.broadcast %cst_21 : f32 to vector<1x128xf32>
    %82 = arith.addf %80, %81 : vector<1x128xf32>
    %c0_22 = arith.constant 0 : index
    %c0_23 = arith.constant 0 : index
    %83 = vector.load %arg5[%c0_22, %c0_23] : memref<1x128xf32, #tpu.memory_space<vmem>>, vector<1x128xf32>
    tpu.vector_store %arg5[%c0_22, %c0_23], %82 {strides = array<i32>} : memref<1x128xf32, #tpu.memory_space<vmem>>, vector<1x128xf32>,
    return
  }
  func.func @transform_0(%arg0: i32) -> i32 {
    %c0_i32 = arith.constant 0 : i32
    %c0_i32_0 = arith.constant 0 : i32
    return %c0_i32 : i32
  }
  func.func @transform_1(%arg0: i32) -> (i32, i32) {
    %c0_i32 = arith.constant 0 : i32
    %c0_i32_0 = arith.constant 0 : i32
    %c0_i32_1 = arith.constant 0 : i32
    return %c0_i32, %c0_i32_0 : i32, i32
  }
  func.func @transform_2(%arg0: i32) -> (i32, i32) {
    %c0_i32 = arith.constant 0 : i32
    %c0_i32_0 = arith.constant 0 : i32
    %c0_i32_1 = arith.constant 0 : i32
    return %c0_i32, %c0_i32_0 : i32, i32
  }
  func.func @transform_3(%arg0: i32) -> (i32, i32) {
    %c0_i32 = arith.constant 0 : i32
    %c0_i32_0 = arith.constant 0 : i32
    return %arg0, %c0_i32 : i32, i32
  }
  func.func @transform_4(%arg0: i32) -> (i32, i32) {
    %c0_i32 = arith.constant 0 : i32
    %c0_i32_0 = arith.constant 0 : i32
    return %c0_i32, %arg0 : i32, i32
  }
}

</mosaic_0001>

<bundles_post_ra>
// kernel: model_forward.1
= control target key start
LH: loop header
LB: loop body
LE: loop exit
PB: predicated region body
PF: predicated region fallthrough
CT: control target
= control target key end

     0   :  { %9 = vsyncpa [#allocation4], 0  ;;  %s642_s0 = inlined_call_operand.vmem [shape: f32[8], index: 0, kind: input, shape index: {}]   ;;  %s643_s1 = inlined_call_operand.vmem [shape: f32[32,40], index: 1, kind: input, shape index: {}]   ;;  %s644_s2 = inlined_call_operand.vmem [shape: f32[8,32], index: 2, kind: input, shape index: {}]   ;;  %s645_s3 = inlined_call_operand.vmem [shape: f32[8,4], index: 3, kind: input, shape index: {}]   ;;  %s646_s4 = inlined_call_operand.hbm [shape: f32[1,8], index: 4, kind: output, shape index: {}]  }
   0x1   :  { %10 = vsyncpa [#allocation3], 0  ;;  %s16_s17 = sshll.u32 %s642_s0, 4  ;;  %s479_s18 = smov [#allocation2]   ;;  %s17_s17 = int_to_ptr.vmem [resolvable:$true] %s16_s17 }
   0x2   :  { %19 = dma.vmem_to_smem %s17_s17, 16, %s479_s18, [#allocation4]  }
   0x3   :  { %475 = dma.done.wait [#allocation4], 16  }
   0x4   :  { %476 = vsyncadd [#allocation4], 4294967280 }
   0x5   :  { %30 = sfence }
   0x6   :  { %v517_v0 = vld [vmem:[%s643_s1] sm:$0xff]  ;;  %v522_v1 = vld [vmem:[%s643_s1 + $0x10] sm:$0xff]  ;;  %vm80_vm0 = vcmask 31744   ;;  %s480_s23 = smov 96   ;;  %v51_v2 = vld [vmem:[%s645_s3 + $0x78] sm:$0xff]  ;;  %v481_v20 = vmov 36  }
   0x7   :  { %72 = vrot.lane.b32.xlu0 %v517_v0, %s480_s23  ;;  %76 = vrot.lane.b32.xlu1 %v522_v1, %s480_s23  ;;  %v50_v3 = vld [vmem:[%s645_s3 + $0x70] sm:$0xff]  ;;  %v536_v4 = vld [vmem:[%s643_s1 + $0x8] sm:$0xff]  ;;  %v482_v28 = vmov 37   ;;  %vm186_vm1 = vcmask 261120   ;;  %v483_v43 = vmov 38   ;;  %v484_v44 = vmov 39  }
   0x8   :  { %376 = vmatpush.xpose.msk.msra.mxu0 %vm80_vm0, %v51_v2  ;;  %v541_v5 = vld [vmem:[%s643_s1 + $0x18] sm:$0xff]  ;;  %v49_v6 = vld [vmem:[%s645_s3 + $0x68] sm:$0xff]  ;;  %v48_v7 = vld [vmem:[%s645_s3 + $0x60] sm:$0xff]  ;;  %418 = vset.pattern.permute.xlu1 %v481_v20  ;;  %s251_s6 = sld [smem:[#allocation2]]  ;;  %s485_s12 = smov [#allocation5]  }
   0x9   :  { %v47_v8 = vld [vmem:[%s645_s3 + $0x58] sm:$0xff]  ;;  %v46_v9 = vld [vmem:[%s645_s3 + $0x50] sm:$0xff]  ;;  %v45_v10 = vld [vmem:[%s645_s3 + $0x48] sm:$0xff]  ;;  %417 = vset.pattern.permute.xlu0 %v481_v20  ;;  %416 = vset.pattern.permute.xlu2 %v481_v20  ;;  %s401_s7 = sld [smem:[#allocation2 + $0x2]]  ;;  %s364_s13 = sshll.u32 %s485_s12, 4  ;;  %s365_s13 = int_to_ptr.vmem [resolvable:$true] %s364_s13 }
   0xa   :  { %v44_v11 = vld [vmem:[%s645_s3 + $0x40] sm:$0xff]  ;;  %v43_v12 = vld [vmem:[%s645_s3 + $0x38] sm:$0xff]  ;;  %v42_v13 = vld [vmem:[%s645_s3 + $0x30] sm:$0xff]  ;;  %69 = vperm.xlu2 %416, %v541_v5   ;;  %s405_s8 = sld [smem:[#allocation2 + $0x4]]  ;;  %s366_s16 = sshll.u32 %s646_s4, 4  ;;  %s367_s16 = int_to_ptr.hbm [resolvable:$true] %s366_s16 }
   0xb   :  { %v41_v14 = vld [vmem:[%s645_s3 + $0x28] sm:$0xff]  ;;  %v40_v15 = vld [vmem:[%s645_s3 + $0x20] sm:$0xff]  ;;  %v39_v16 = vld [vmem:[%s645_s3 + $0x18] sm:$0xff]  ;;  %s403_s1 = sld [smem:[#allocation2 + $0x3]] }
   0xc   :  { %377 = vmatpush.xpose.msk.msra.mxu0 %vm80_vm0, %v50_v3  ;;  %v38_v17 = vld [vmem:[%s645_s3 + $0x10] sm:$0xff]  ;;  %v37_v18 = vld [vmem:[%s645_s3 + $0x8] sm:$0xff]  ;;  %v36_v19 = vld [vmem:[%s645_s3] sm:$0xff]  ;;  %s402_s9 = sld [smem:[#allocation2 + $0x5]] }
   0xd   :  { %v632_v60 = vld [vmem:[%s644_s2] sm:$0xff]  ;;  %s406_s10 = sld [smem:[#allocation2 + $0x7]] }
   0xe   :  { %v252_v61 = vstv %s251_s6  ;;  %s404_s11 = sld [smem:[#allocation2 + $0x6]] }
   0xf   :  { %74 = vrot.lane.b32.xlu0 %v536_v4, %s480_s23  ;;  %78 = vrot.lane.b32.xlu1 %v541_v5, %s480_s23  ;;  %s408_s2 = sld [smem:[#allocation2 + $0x1]] }
  0x10   :  { %378 = vmatpush.xpose.msk.msra.mxu0 %vm80_vm0, %v49_v6  ;;  %v273_v2 = vstv %s405_s8 }
  0x12   :  { %64 = vperm.xlu2 %416, %v522_v1  }
  0x14   :  { %379 = vmatpush.xpose.msk.msra.mxu0 %vm80_vm0, %v48_v7  ;;  %v276_v7 = vstv %s406_s10 }
  0x17   :  { %54 = vperm.xlu1 %418, %v517_v0   ;;  %59 = vperm.xlu0 %417, %v536_v4  }
  0x18   :  { %380 = vmatpush.xpose.msk.msra.mxu0 %vm80_vm0, %v47_v8 }
  0x1a   :  { %419 = vset.pattern.permute.xlu2 %v482_v28 }
  0x1b   :  { %183 = vperm.xlu2 %419, %v541_v5  }
  0x1c   :  { %381 = vmatpush.xpose.msk.msra.mxu0 %vm80_vm0, %v46_v9 }
  0x1f   :  { %421 = vset.pattern.permute.xlu0 %v482_v28  ;;  %420 = vset.pattern.permute.xlu1 %v482_v28 }
  0x20   :  { %382 = vmatpush.xpose.msk.msra.mxu0 %vm80_vm0, %v45_v10  ;;  %171 = vperm.xlu0 %421, %v517_v0   ;;  %v269_v10 = vstv %s404_s11 }
  0x21   :  { %179 = vperm.xlu1 %420, %v522_v1  }
  0x23   :  { %175 = vperm.xlu2 %419, %v536_v4  }
  0x24   :  { %383 = vmatpush.xpose.msk.msra.mxu0 %vm80_vm0, %v44_v11 }
  0x28   :  { %384 = vmatpush.xpose.msk.msra.mxu0 %vm80_vm0, %v43_v12  ;;  %425 = vset.pattern.permute.xlu0 %v484_v44 }
  0x29   :  { %422 = vset.pattern.permute.xlu1 %v483_v43  ;;  %315 = vperm.xlu0 %425, %v522_v1  }
  0x2a   :  { %298 = vperm.xlu1 %422, %v541_v5  }
  0x2b   :  { %423 = vset.pattern.permute.xlu2 %v483_v43 }
  0x2c   :  { %385 = vmatpush.xpose.msk.msra.mxu0 %vm80_vm0, %v42_v13  ;;  %294 = vperm.xlu2 %423, %v522_v1  }
  0x30   :  { %386 = vmatpush.xpose.msk.msra.mxu0 %vm80_vm0, %v41_v14 }
  0x32   :  { %424 = vset.pattern.permute.xlu1 %v484_v44 }
  0x33   :  { %319 = vperm.xlu1 %424, %v541_v5  }
  0x34   :  { %387 = vmatpush.xpose.msk.msra.mxu0 %vm80_vm0, %v40_v15  ;;  %290 = vperm.xlu2 %423, %v536_v4  }
  0x38   :  { %388 = vmatpush.xpose.msk.msra.mxu0 %vm80_vm0, %v39_v16 }
  0x3b   :  { %426 = vset.pattern.permute.xlu1 %v483_v43 }
  0x3c   :  { %389 = vmatpush.xpose.msk.msra.mxu0 %vm80_vm0, %v38_v17  ;;  %286 = vperm.xlu1 %426, %v517_v0  }
  0x3d   :  { %427 = vset.pattern.permute.xlu2 %v484_v44 }
  0x3e   :  { %311 = vperm.xlu2 %427, %v536_v4  }
  0x40   :  { %390 = vmatpush.xpose.msk.msra.mxu0 %vm80_vm0, %v37_v18 }
  0x44   :  { %391 = vmatpush.xpose.msk.msra.mxu0 %vm80_vm0, %v36_v19  ;;  %428 = vset.pattern.permute.xlu1 %v484_v44 }
  0x45   :  { %307 = vperm.xlu1 %428, %v517_v0  }
  0x64   :  { %v70_v27 = vpop.permute.xlu2 %69 }
  0x6c   :  { %v65_v30 = vpop.permute.xlu2 %64 }
  0x75   :  { %v184_v46 = vpop.permute.xlu2 %183 }
  0x79   :  { %v73_v21 = vpop.permute.xlu0 %72  ;;  %v77_v23 = vpop.permute.xlu1 %76 }
  0x7a   :  { %392 = vmatmul.msk.f32.vlgmr.msra.gmra.mxu0 %vm80_vm0, %v73_v21 }
  0x7d   :  { %v176_v49 = vpop.permute.xlu2 %175 }
  0x81   :  { %v75_v22 = vpop.permute.xlu0 %74  ;;  %v79_v24 = vpop.permute.xlu1 %78 }
  0x82   :  { %393 = vmatmul.msk.f32.gmra.mxu0 %vm80_vm0, %v75_v22 }
  0x86   :  { %v295_v18 = vpop.permute.xlu2 %294 }
  0x89   :  { %v60_v31 = vpop.permute.xlu0 %59  ;;  %v55_v35 = vpop.permute.xlu1 %54 }
  0x8a   :  { %394 = vmatmul.msk.f32.gmra.mxu0 %vm80_vm0, %v77_v23 }
  0x92   :  { %395 = vmatmul.msk.f32.gmra.mxu0 %vm80_vm0, %v79_v24  ;;  %v172_v53 = vpop.permute.xlu0 %171 }
  0x93   :  { %v180_v48 = vpop.permute.xlu1 %179 }
  0x9c   :  { %v299_v12 = vpop.permute.xlu1 %298 }
  0xa5   :  { %v320_v19 = vpop.permute.xlu1 %319 }
  0xf7   :  { %v154_v25 = vpop.f32.mrf.mxu0 }
  0xf8   :  { %v155_v38 = vadd.f32 %v154_v25, %v55_v35  ;;  %v291_v25 = vpop.permute.xlu2 %290 }
  0xfa   :  { %v166_v41 = vmax.f32 %v155_v38, 0.0 }
  0xff   :  { %v157_v26 = vpop.f32.mrf.mxu0 }
 0x100   :  { %v158_v36 = vadd.f32 %v157_v26, %v60_v31  ;;  %v287_v26 = vpop.permute.xlu1 %286  ;;  %v316_v31 = vpop.permute.xlu0 %315 }
 0x101   :  { %v312_v35 = vpop.permute.xlu2 %311 }
 0x102   :  { %v167_v40 = vmax.f32 %v158_v36, 0.0 }
 0x107   :  { %v160_v29 = vpop.f32.mrf.mxu0 }
 0x108   :  { %v161_v33 = vadd.f32 %v160_v29, %v65_v30 }
 0x10a   :  { %v168_v39 = vmax.f32 %v161_v33, 0.0 }
 0x10f   :  { %v163_v32 = vpop.f32.mrf.mxu0 }
 0x110   :  { %v164_v34 = vadd.f32 %v163_v32, %v70_v27 }
 0x112   :  { %v169_v37 = vmax.f32 %v164_v34, 0.0 }
 0x114   :  { %207 = vmatpush.msra.mxu1 %v169_v37 }
 0x116   :  { %208 = vmatpush.msra.mxu1 %v168_v39  ;;  %v308_v39 = vpop.permute.xlu1 %307 }
 0x118   :  { %209 = vmatpush.msra.mxu1 %v167_v40 }
 0x11a   :  { %210 = vmatpush.msra.mxu1 %v166_v41 }
 0x11b   :  { %396 = vmatmul.msk.f32.vlgmr.msra.gmra.mxu1 %vm186_vm1, %v517_v0 }
 0x123   :  { %397 = vmatmul.msk.f32.gmra.mxu1 %vm186_vm1, %v536_v4  ;;  %v259_v4 = vstv %s402_s9 }
 0x12b   :  { %398 = vmatmul.msk.f32.gmra.mxu1 %vm186_vm1, %v522_v1  ;;  %v256_v1 = vstv %s401_s7 }
 0x133   :  { %399 = vmatmul.msk.f32.gmra.mxu1 %vm186_vm1, %v541_v5  ;;  %v266_v5 = vstv %s403_s1 }
 0x198   :  { %v212_v42 = vpop.f32.mrf.mxu1 }
 0x199   :  { %v213_v56 = vadd.f32 %v212_v42, %v172_v53 }
 0x19b   :  { %v224_v59 = vmax.f32 %v213_v56, 0.0 }
 0x1a0   :  { %v215_v45 = vpop.f32.mrf.mxu1 }
 0x1a1   :  { %v216_v54 = vadd.f32 %v215_v45, %v176_v49 }
 0x1a3   :  { %v225_v58 = vmax.f32 %v216_v54, 0.0 }
 0x1a8   :  { %v218_v47 = vpop.f32.mrf.mxu1 }
 0x1a9   :  { %v219_v51 = vadd.f32 %v218_v47, %v180_v48  ;;  %v352_v47 = vstv %s408_s2 }
 0x1ab   :  { %v226_v57 = vmax.f32 %v219_v51, 0.0 }
 0x1b0   :  { %v221_v50 = vpop.f32.mrf.mxu1 }
 0x1b1   :  { %v222_v52 = vadd.f32 %v221_v50, %v184_v46 }
 0x1b3   :  { %v227_v55 = vmax.f32 %v222_v52, 0.0 }
 0x1b5   :  { %243 = vmatpush.msra.mxu2 %v227_v55 }
 0x1b7   :  { %244 = vmatpush.msra.mxu2 %v226_v57 }
 0x1b9   :  { %245 = vmatpush.msra.mxu2 %v225_v58 }
 0x1bb   :  { %246 = vmatpush.msra.mxu2 %v224_v59 }
 0x1bc   :  { %400 = vmatmul.msk.f32.vlgmr.msra.gmra.mxu2 %vm186_vm1, %v632_v60 }
 0x23f   :  { %v248_v62 = vpop.f32.mrf.mxu2 }
 0x240   :  { %v253_v63 = vadd.f32 %v252_v61, %v248_v62 }
 0x242   :  { %v254_v3 = vmax.f32 %v253_v63, 0.0 }
 0x244   :  { %v257_v0 = vmul.f32 %v256_v1, %v254_v3  ;;  %v274_v6 = vmul.f32 %v273_v2, %v254_v3  ;;  %v267_v9 = vmul.f32 %v266_v5, %v254_v3 }
 0x246   :  { %v260_v8 = vadd.f32 %v259_v4, %v257_v0  ;;  %v277_v11 = vadd.f32 %v276_v7, %v274_v6  ;;  %v270_v14 = vadd.f32 %v269_v10, %v267_v9 }
 0x248   :  { %v261_v13 = vmul.f32 0.5, %v260_v8  ;;  %v278_v15 = vmul.f32 0.5, %v277_v11 }
 0x24a   :  { %429 = vtanh.f32 %v261_v13 }
 0x24b   :  { %431 = vtanh.f32 %v270_v14 }
 0x24c   :  { %433 = vtanh.f32 %v278_v15 }
 0x250   :  { %v430_v16 = vpop.eup %429 }
 0x251   :  { %v263_v17 = vmul.f32 0.5, %v430_v16  ;;  %v432_v21 = vpop.eup %431 }
 0x252   :  { %v434_v22 = vpop.eup %433 }
 0x253   :  { %v264_v20 = vadd.f32 0.5, %v263_v17  ;;  %v280_v24 = vmul.f32 0.5, %v434_v22 }
 0x255   :  { %v282_v23 = vmul.f32 %v432_v21, %v264_v20  ;;  %v281_v27 = vadd.f32 0.5, %v280_v24 }
 0x257   :  { %435 = vtanh.f32 %v282_v23 }
 0x25d   :  { %v436_v28 = vpop.eup %435 }
 0x25e   :  { %v284_v29 = vmul.f32 %v436_v28, %v281_v27 }
 0x260   :  { %v301_v30 = vperm.slane %v284_v29, 0 }
 0x262   :  { %v305_v32 = vmul.f32 %v301_v30, %v299_v12  ;;  %v304_v33 = vmul.f32 %v301_v30, %v295_v18  ;;  %v303_v34 = vmul.f32 %v301_v30, %v291_v25  ;;  %v302_v36 = vmul.f32 %v301_v30, %v287_v26 }
 0x264   :  { %v324_v37 = vadd.f32 %v316_v31, %v304_v33  ;;  %v325_v38 = vadd.f32 %v320_v19, %v305_v32  ;;  %v323_v40 = vadd.f32 %v312_v35, %v303_v34  ;;  %v322_v42 = vadd.f32 %v308_v39, %v302_v36 }
 0x266   :  { %v329_v41 = vmax.f32 %v325_v38, 0.0  ;;  %v328_v43 = vmax.f32 %v324_v37, 0.0  ;;  %v327_v44 = vmax.f32 %v323_v40, 0.0  ;;  %v326_v45 = vmax.f32 %v322_v42, 0.0 }
 0x268   :  { %342 = vmatpush.msra.mxu3 %v329_v41 }
 0x26a   :  { %343 = vmatpush.msra.mxu3 %v328_v43 }
 0x26c   :  { %344 = vmatpush.msra.mxu3 %v327_v44 }
 0x26e   :  { %345 = vmatpush.msra.mxu3 %v326_v45 }
 0x26f   :  { %407 = vmatmul.msk.f32.vlgmr.msra.gmra.mxu3 %vm186_vm1, %v632_v60 }
 0x2f2   :  { %v347_v46 = vpop.f32.mrf.mxu3 }
 0x2f3   :  { %v350_v48 = vadd.f32 %v347_v46, %v248_v62 }
 0x2f5   :  { %v353_v49 = vadd.f32 %v352_v47, %v350_v48 }
 0x2f7   :  { %v354_v50 = vmul.f32 0.5, %v353_v49 }
 0x2f9   :  { %437 = vtanh.f32 %v354_v50 }
 0x2ff   :  { %v438_v51 = vpop.eup %437 }
 0x300   :  { %v356_v52 = vmul.f32 0.5, %v438_v51 }
 0x302   :  { %v357_v53 = vadd.f32 0.5, %v356_v52 }
 0x304   :  { %358 = vst [vmem:[#allocation5 - $0x1] sm:$0x2] %v357_v53 }
 0x305   :  { %369 = dma.vmem_to_hbm [thread:$0]  %s365_s13, 16, %s367_s16, [#allocation3]  }
 0x306   :  { %477 = dma.done.wait [#allocation3], 16  }
 0x307   :  { %478 = vsyncadd [#allocation3], 4294967280 }
 0x308   :  { %374 = vsyncpa [#allocation3], 1 }
 0x309   :  { %375 = vsyncpa [#allocation4], 1 }

</bundles_post_ra>
